<compile_context>
chip_gen: v7x
topology: tpu7x:2x2x1
jax: 0.10.0
libtpu: 0.0.40
codegen_flags: <defaults>
</compile_context>

<pallas_src>
import functools

import jax
import jax.numpy as jnp
from jax.experimental import pallas as pl
from jax.experimental.pallas import tpu as pltpu


def _round_up(x, m):
    return ((x + m - 1) // m) * m


def _cdiv(a, b):
    return -(-a // b)


# ---------------------------------------------------------------------------
# Kernel
# ---------------------------------------------------------------------------
def _matmul_bf16_kernel(q_ref, k_ref, o_ref, acc_ref):
    k_idx = pl.program_id(2)
    n_k = pl.num_programs(2)

    # bf16 x bf16 -> f32 on the MXU.
    partial = jnp.dot(q_ref[...], k_ref[...], preferred_element_type=jnp.float32)

    # Zero the f32 accumulator at the start of the reduction (K) axis.
    @pl.when(k_idx == 0)
    def _():
        acc_ref[...] = jnp.zeros_like(acc_ref)

    # Accumulate into scratch on all but the last K step.
    @pl.when(k_idx < n_k - 1)
    def _():
        acc_ref[...] += partial

    # Last K step: combine once and write bf16 directly
    # (skips the extra acc writeback + reload of the previous version).
    @pl.when(k_idx == n_k - 1)
    def _():
        o_ref[...] = (acc_ref[...] + partial).astype(o_ref.dtype)


# ---------------------------------------------------------------------------
# Trace-time device / tile configuration (pure Python, outside jit)
# ---------------------------------------------------------------------------
@functools.lru_cache(maxsize=1)
def _device_config():
    """Physical VMEM capacity and TensorCore count (best effort, safe fallbacks)."""
    vmem_cap = 64 * 1024 * 1024   # conservative fallback (v7x-sized VMEM)
    num_tc = 1
    try:
        info = pltpu.get_tpu_info()
        vmem_cap = int(info.vmem_capacity_bytes)
        for attr in ("num_cores", "num_tensorcores", "tensorcore_count"):
            v = getattr(info, attr, None)
            if isinstance(v, int) and v > 0:
                num_tc = v
                break
    except Exception:
        pass
    if num_tc == 1:
        try:
            kind = jax.devices()[0].device_kind.lower()
            if "v7" in kind:        # v7x: 2 TensorCores per chip
                num_tc = 2
        except Exception:
            pass
    return vmem_cap, num_tc


def _fit_dim(dim, cap):
    """Largest 128-aligned tile <= cap that (nearly) divides round_up(dim, 128).

    Keeps padding to the unavoidable <128 alignment residue plus a small
    per-tile balance remainder, instead of padding out a full extra tile.
    """
    aligned = _round_up(dim, 128)
    cap = max(128, min(cap, aligned))
    n_tiles = _cdiv(aligned, cap)
    return _round_up(_cdiv(aligned, n_tiles), 128)


def _pick_config(M, N, K):
    vmem_cap, num_tc = _device_config()

    # Scoped-VMEM limit handed to Mosaic: ~78% of physical, capped at 100 MiB
    # (=> ~100 MiB on 128-MiB v5e/v6e, ~48-50 MiB on 64-MiB v7x).
    vmem_limit = max(32 * 1024 * 1024, min(int(vmem_cap * 0.78), 100 * 1024 * 1024))
    # Head-room inside that limit for compiler-internal scratch.
    tile_budget = vmem_limit - 8 * 1024 * 1024

    def vmem_needed(tm, tn, tk):
        return (2 * (tm * tk * 2)      # q tiles, double-buffered, bf16
                + 2 * (tk * tn * 2)    # k tiles, double-buffered, bf16
                + tm * tn * 4          # f32 accumulator scratch
                + 2 * (tm * tn * 2))   # output tiles, double-buffered, bf16

    # Generation-aware tile ceilings: 2048-class M/N tiles where VMEM is
    # plentiful (v5e/v6e), 1024-class on v7x.
    if tile_budget >= 64 * 1024 * 1024:
        mn_caps = (2048, 1536, 1024, 768, 512, 384, 256, 128)
    else:
        mn_caps = (1024, 768, 512, 384, 256, 128)
    k_caps = (1024, 512, 256, 128)

    tm = tn = tk = 128
    found = False
    for mn_cap in mn_caps:
        tm_c = _fit_dim(M, mn_cap)
        tn_c = _fit_dim(N, mn_cap)
        for k_cap in k_caps:
            tk_c = _fit_dim(K, k_cap)
            if vmem_needed(tm_c, tn_c, tk_c) <= tile_budget:
                tm, tn, tk = tm_c, tn_c, tk_c
                found = True
                break
        if found:
            break

    # Megacore: only on chips with >1 TensorCore.  Split tm (keeps the output
    # lane-dense at full tn) until the parallel (i, j) grid has work for all
    # cores; re-check the grid after every split.
    if num_tc > 1:
        def grid_par(tm_, tn_):
            return _cdiv(M, tm_) * _cdiv(N, tn_)
        while grid_par(tm, tn) < num_tc and tm > 128:
            tm = max(128, _round_up(_cdiv(tm, 2), 128))

    return tm, tn, tk, vmem_limit


# ---------------------------------------------------------------------------
# Jitted pallas_call wrapper (static tiling / vmem config)
# ---------------------------------------------------------------------------
@functools.partial(jax.jit, static_argnames=("tm", "tn", "tk", "vmem_limit"))
def _matmul_bf16_call(q, k, *, tm, tn, tk, vmem_limit):
    M, K = q.shape
    _, N = k.shape

    q = q.astype(jnp.bfloat16)
    k = k.astype(jnp.bfloat16)

    M_pad = _round_up(M, tm)
    N_pad = _round_up(N, tn)
    K_pad = _round_up(K, tk)
    # Padding is limited to the <128 alignment residue (plus a small
    # tile-balance remainder) by construction of the tiles; zero padding is
    # exact for matmul.
    if (M_pad, K_pad) != (M, K):
        q = jnp.pad(q, ((0, M_pad - M), (0, K_pad - K)))
    if (K_pad, N_pad) != (K, N):
        k = jnp.pad(k, ((0, K_pad - K), (0, N_pad - N)))

    grid = (M_pad // tm, N_pad // tn, K_pad // tk)

    cost = pl.CostEstimate(
        flops=2 * M * N * K,
        bytes_accessed=2 * (M * K + K * N + M * N),
        transcendentals=0,
    )

    out_padded = pl.pallas_call(
        _matmul_bf16_kernel,
        out_shape=jax.ShapeDtypeStruct((M_pad, N_pad), jnp.bfloat16),
        grid_spec=pltpu.PrefetchScalarGridSpec(
            num_scalar_prefetch=0,
            grid=grid,
            in_specs=[
                pl.BlockSpec((tm, tk), lambda i, j, kk: (i, kk)),
                pl.BlockSpec((tk, tn), lambda i, j, kk: (kk, j)),
            ],
            out_specs=pl.BlockSpec((tm, tn), lambda i, j, kk: (i, j)),
            scratch_shapes=[pltpu.VMEM((tm, tn), jnp.float32)],
        ),
        compiler_params=pltpu.CompilerParams(
            dimension_semantics=("parallel", "parallel", "arbitrary"),
            vmem_limit_bytes=vmem_limit,
        ),
        cost_estimate=cost,
    )(q, k)

    if (M_pad, N_pad) != (M, N):
        out_padded = out_padded[:M, :N]
    return out_padded


def matmul_bf16(q, k):
    """C = q @ k in bf16 with f32 accumulation (Pallas TPU kernel)."""
    M, K = q.shape
    K2, N = k.shape
    assert K == K2, f"inner dims must match: {K} vs {K2}"
    tm, tn, tk, vmem_limit = _pick_config(M, N, K)
    return _matmul_bf16_call(q, k, tm=tm, tn=tn, tk=tk, vmem_limit=vmem_limit)


if __name__ == "__main__":
    key = jax.random.PRNGKey(0)

    def _check(M, K, N, subkey):
        kq, kk = jax.random.split(subkey)
        q = jax.random.normal(kq, (M, K), dtype=jnp.float32).astype(jnp.bfloat16)
        k = jax.random.normal(kk, (K, N), dtype=jnp.float32).astype(jnp.bfloat16)
        out = matmul_bf16(q, k)
        out = jax.block_until_ready(out)
        ref = jnp.dot(
            q.astype(jnp.float32), k.astype(jnp.float32)
        ).astype(jnp.bfloat16)
        assert out.shape == (M, N) and out.dtype == jnp.bfloat16
        err = float(
            jnp.max(jnp.abs(out.astype(jnp.float32) - ref.astype(jnp.float32)))
        )
        assert err < 1.0, f"max abs err too large ({M}x{K}x{N}): {err}"

    k1, k2 = jax.random.split(key)
    # Small, evenly-tiling case.
    _check(128, 256, 128, k1)
    # Ragged case exercising the alignment-padding path.
    _check(96, 192, 160, k2)

    print("KERNEL_OK")
</pallas_src>

<mosaic_0001>
module attributes {stable_mosaic.version = 11 : i64} {
  func.func @_matmul_bf16_kernel(%arg0: i32, %arg1: i32, %arg2: i32, %arg3: memref<128x256xbf16, #tpu.memory_space<vmem>>, %arg4: memref<256x128xbf16, #tpu.memory_space<vmem>>, %arg5: memref<128x128xbf16, #tpu.memory_space<vmem>>, %arg6: memref<128x128xf32, #tpu.memory_space<vmem>>) attributes {dimension_semantics = [#tpu.dimension_semantics<parallel>, #tpu.dimension_semantics<parallel>, #tpu.dimension_semantics<arbitrary>], iteration_bounds = array<i64: 1, 1, 1>, scalar_prefetch = 0 : i64, scratch_operands = 1 : i64, tpu.core_type = #tpu.core_type<tc>, window_params = [{transform_indices = @transform_0, window_bounds = array<i64: 128, 256>}, {transform_indices = @transform_1, window_bounds = array<i64: 256, 128>}, {transform_indices = @transform_2, window_bounds = array<i64: 128, 128>}]} {
    %c0 = arith.constant 0 : index
    %c0_0 = arith.constant 0 : index
    %0 = vector.load %arg3[%c0, %c0_0] : memref<128x256xbf16, #tpu.memory_space<vmem>>, vector<128x256xbf16>
    %c0_1 = arith.constant 0 : index
    %c0_2 = arith.constant 0 : index
    %1 = vector.load %arg4[%c0_1, %c0_2] : memref<256x128xbf16, #tpu.memory_space<vmem>>, vector<256x128xbf16>
    %cst = arith.constant dense<0.000000e+00> : vector<128x128xf32>
    %2 = tpu.matmul %0, %1, %cst {dimension_numbers = #tpu.dot_dimension_numbers<[1], [0], [0], [1], [0, 0, 1, 1], [], []>} : vector<128x256xbf16>, vector<256x128xbf16>, vector<128x128xf32> -> vector<128x128xf32>
    %c0_i32 = arith.constant 0 : i32
    %3 = arith.cmpi eq, %arg2, %c0_i32 : i32
    %4 = arith.extui %3 : i1 to i32
    %c0_i32_3 = arith.constant 0 : i32
    %5 = arith.cmpi ne, %4, %c0_i32_3 : i32
    scf.if %5 {
      %cst_8 = arith.constant 0.000000e+00 : f32
      %12 = vector.broadcast %cst_8 : f32 to vector<128x128xf32>
      %c0_9 = arith.constant 0 : index
      %c0_10 = arith.constant 0 : index
      %13 = vector.load %arg6[%c0_9, %c0_10] : memref<128x128xf32, #tpu.memory_space<vmem>>, vector<128x128xf32>
      tpu.vector_store %arg6[%c0_9, %c0_10], %12 {strides = array<i32>} : memref<128x128xf32, #tpu.memory_space<vmem>>, vector<128x128xf32>,
    } else {
    }
    %c0_i32_4 = arith.constant 0 : i32
    %6 = arith.cmpi slt, %arg2, %c0_i32_4 : i32
    %7 = arith.extui %6 : i1 to i32
    %c0_i32_5 = arith.constant 0 : i32
    %8 = arith.cmpi ne, %7, %c0_i32_5 : i32
    scf.if %8 {
      %c0_8 = arith.constant 0 : index
      %c0_9 = arith.constant 0 : index
      %12 = vector.load %arg6[%c0_8, %c0_9] : memref<128x128xf32, #tpu.memory_space<vmem>>, vector<128x128xf32>
      %13 = arith.addf %12, %2 : vector<128x128xf32>
      %c0_10 = arith.constant 0 : index
      %c0_11 = arith.constant 0 : index
      %14 = vector.load %arg6[%c0_10, %c0_11] : memref<128x128xf32, #tpu.memory_space<vmem>>, vector<128x128xf32>
      tpu.vector_store %arg6[%c0_10, %c0_11], %13 {strides = array<i32>} : memref<128x128xf32, #tpu.memory_space<vmem>>, vector<128x128xf32>,
    } else {
    }
    %c0_i32_6 = arith.constant 0 : i32
    %9 = arith.cmpi eq, %arg2, %c0_i32_6 : i32
    %10 = arith.extui %9 : i1 to i32
    %c0_i32_7 = arith.constant 0 : i32
    %11 = arith.cmpi ne, %10, %c0_i32_7 : i32
    scf.if %11 {
      %c0_8 = arith.constant 0 : index
      %c0_9 = arith.constant 0 : index
      %12 = vector.load %arg6[%c0_8, %c0_9] : memref<128x128xf32, #tpu.memory_space<vmem>>, vector<128x128xf32>
      %13 = arith.addf %12, %2 : vector<128x128xf32>
      %14 = arith.truncf %13 : vector<128x128xf32> to vector<128x128xbf16>
      %c0_10 = arith.constant 0 : index
      %c0_11 = arith.constant 0 : index
      %15 = vector.load %arg5[%c0_10, %c0_11] : memref<128x128xbf16, #tpu.memory_space<vmem>>, vector<128x128xbf16>
      tpu.vector_store %arg5[%c0_10, %c0_11], %14 {strides = array<i32>} : memref<128x128xbf16, #tpu.memory_space<vmem>>, vector<128x128xbf16>,
    } else {
    }
    return
  }
  func.func @transform_0(%arg0: i32, %arg1: i32, %arg2: i32) -> (i32, i32) {
    %c0_i32 = arith.constant 0 : i32
    return %arg0, %arg2 : i32, i32
  }
  func.func @transform_1(%arg0: i32, %arg1: i32, %arg2: i32) -> (i32, i32) {
    %c0_i32 = arith.constant 0 : i32
    return %arg2, %arg1 : i32, i32
  }
  func.func @transform_2(%arg0: i32, %arg1: i32, %arg2: i32) -> (i32, i32) {
    %c0_i32 = arith.constant 0 : i32
    return %arg0, %arg1 : i32, i32
  }
}

</mosaic_0001>

<bundles_post_ra>
// kernel: _matmul_bf16_call.1
= control target key start
LH: loop header
LB: loop body
LE: loop exit
PB: predicated region body
PF: predicated region fallthrough
CT: control target
= control target key end

     0   :  { %7 = vsyncpa [#allocation4], 0  ;;  %s941_s0 = inlined_call_operand.hbm [shape: bf16[128,256], index: 0, kind: input, shape index: {}]   ;;  %s942_s1 = inlined_call_operand.hbm [shape: bf16[256,128], index: 1, kind: input, shape index: {}]   ;;  %s943_s2 = inlined_call_operand.hbm [shape: bf16[128,128], index: 2, kind: output, shape index: {}]  }
   0x1   :  { %8 = vsyncpa [#allocation7], 0 }
   0x2   :  { %9 = vsyncpa [#allocation5], 0  ;;  %s877_s9 = smov [#allocation3]   ;;  %s805_s13 = scalar_lea.hbm %s941_s0, 2048 }
   0x3   :  { %s15_s10 = sshll.u32 %s877_s9, 4  ;;  %p806_p0 = scmp.ne.s32.totalorder %s941_s0, %s805_s13  ;;  %s16_s10 = int_to_ptr.vmem [resolvable:$true] %s15_s10 }
   0x4   :  { %p809_p1 = scmp.lt.u32.totalorder %s805_s13, %s941_s0 }
   0x6   :  { %p811_p2 = pnand %p809_p1, %p806_p0 }
   0x8   :  { %814 = shalt.err (!%p811_p2)
}
   0x9   :  { %s815_s18 = scalar_lea.vmem %s16_s10, 2048  ;;  %p820_p4 = scmp.lt.s32.totalorder %s16_s10, %s16_s10 }
   0xa   :  { %p816_p3 = scmp.ne.s32.totalorder %s16_s10, %s815_s18  ;;  %p821_p5 = scmp.lt.s32.totalorder %s815_s18, %s815_s18 }
   0xc   :  { %p822_p6 = por %p821_p5, %p820_p4 }
   0xe   :  { %p823_p7 = pnand %p822_p6, %p816_p3 }
  0x10   :  { %826 = shalt.err (!%p823_p7)
}
  0x11   :  { %s878_s19 = smov 128   ;;  %s879_s20 = smov 8  }
  0x12   :  { %21 = dma.hbm_to_vmem [thread:$0]  %s941_s0, 2048, %s16_s10, [#allocation4], %s878_s19, %s878_s19, %s879_s20  }
  0x13   :  { %s880_s23 = smov [#allocation6]   ;;  %s827_s27 = scalar_lea.hbm %s942_s1, 2048 }
  0x14   :  { %s27_s24 = sshll.u32 %s880_s23, 4  ;;  %p828_p8 = scmp.ne.s32.totalorder %s942_s1, %s827_s27  ;;  %s28_s24 = int_to_ptr.vmem [resolvable:$true] %s27_s24 }
  0x15   :  { %p831_p9 = scmp.lt.u32.totalorder %s827_s27, %s942_s1 }
  0x17   :  { %p833_p10 = pnand %p831_p9, %p828_p8 }
  0x19   :  { %836 = shalt.err (!%p833_p10)
}
  0x1a   :  { %s837_s4 = scalar_lea.vmem %s28_s24, 2048  ;;  %p842_p12 = scmp.lt.s32.totalorder %s28_s24, %s28_s24 }
  0x1b   :  { %p838_p11 = scmp.ne.s32.totalorder %s28_s24, %s837_s4  ;;  %p843_p13 = scmp.lt.s32.totalorder %s837_s4, %s837_s4 }
  0x1d   :  { %p844_p0 = por %p843_p13, %p842_p12 }
  0x1f   :  { %p845_p1 = pnand %p844_p0, %p838_p11 }
  0x21   :  { %848 = shalt.err (!%p845_p1)
}
  0x22   :  { %s881_s0 = smov 64   ;;  %s882_s5 = smov 4  }
  0x23   :  { %33 = dma.hbm_to_vmem [thread:$0]  %s942_s1, 2048, %s28_s24, [#allocation7], %s881_s0, %s881_s0, %s882_s5  }
  0x24   :  { %871 = dma.done.wait [#allocation4], 2048  }
  0x25   :  { %872 = vsyncadd [#allocation4], 4294965248 }
  0x26   :  { %873 = dma.done.wait [#allocation7], 2048  }
  0x27   :  { %874 = vsyncadd [#allocation7], 4294965248  ;;  %v765_v0 = vld [vmem:[#allocation6 + $0x40] sm:$0xff]   ;;  %v767_v2 = vld [vmem:[#allocation6 + $0x48] sm:$0xff]   ;;  %s883_s1 = smov [#allocation8]  }
  0x28   :  { %v766_v1 = vld [vmem:[#allocation6] sm:$0xff]   ;;  %678 = vmatprep.subr.bf16.mxu0 %v765_v0  ;;  %742 = vmatprep.subr.bf16.mxu1 %v765_v0  ;;  %v768_v3 = vld [vmem:[#allocation6 + $0x8] sm:$0xff]   ;;  %v769_v4 = vld [vmem:[#allocation6 + $0x50] sm:$0xff]   ;;  %s554_s8 = sshll.u32 %s883_s1, 4  ;;  %s555_s8 = int_to_ptr.vmem [resolvable:$true] %s554_s8 }
  0x29   :  { %679 = vmatpush3.bf16.msra.mxu0 %v766_v1  ;;  %750 = vmatpush3.bf16.msra.mxu1 %v766_v1  ;;  %v770_v5 = vld [vmem:[#allocation6 + $0x10] sm:$0xff]   ;;  %v771_v6 = vld [vmem:[#allocation6 + $0x58] sm:$0xff]   ;;  %v773_v8 = vld [vmem:[#allocation6 + $0x60] sm:$0xff]   ;;  %s849_s9 = scalar_lea.vmem %s555_s8, 1024  ;;  %p854_p3 = scmp.lt.s32.totalorder %s555_s8, %s555_s8 }
  0x2a   :  { %680 = vmatprep.subr.bf16.mxu0 %v767_v2  ;;  %743 = vmatprep.subr.bf16.mxu1 %v767_v2  ;;  %v772_v7 = vld [vmem:[#allocation6 + $0x18] sm:$0xff]   ;;  %v774_v9 = vld [vmem:[#allocation6 + $0x20] sm:$0xff]   ;;  %v775_v10 = vld [vmem:[#allocation6 + $0x68] sm:$0xff]   ;;  %p850_p2 = scmp.ne.s32.totalorder %s555_s8, %s849_s9  ;;  %p855_p4 = scmp.lt.s32.totalorder %s849_s9, %s849_s9 }
  0x2b   :  { %v783_v11 = vld [vmem:[#allocation3 + $0x4] ss:$8 sps:$4 sm:$0xff]   ;;  %v777_v14 = vld [vmem:[#allocation6 + $0x70] sm:$0xff]   ;;  %v779_v16 = vld [vmem:[#allocation6 + $0x78] sm:$0xff]  }
  0x2c   :  { %v786_v12 = vld [vmem:[#allocation3 + $0x44] ss:$8 sps:$4 sm:$0xff]   ;;  %297 = vmatprep.mubr.bf16.mxu0 %v783_v11  ;;  %v778_v15 = vld [vmem:[#allocation6 + $0x30] sm:$0xff]   ;;  %v780_v17 = vld [vmem:[#allocation6 + $0x38] sm:$0xff]   ;;  %p856_p5 = por %p855_p4, %p854_p3 }
  0x2d   :  { %681 = vmatpush3.bf16.msra.mxu0 %v768_v3  ;;  %751 = vmatpush3.bf16.msra.mxu1 %v768_v3  ;;  %v776_v13 = vld [vmem:[#allocation6 + $0x28] sm:$0xff]   ;;  %v787_v20 = vld [vmem:[#allocation3 + $0x14] ss:$8 sps:$4 sm:$0xff]   ;;  %v791_v22 = vld [vmem:[#allocation3 + $0x10] ss:$8 sps:$4 sm:$0xff]  }
  0x2e   :  { %682 = vmatprep.subr.bf16.mxu0 %v769_v4  ;;  %744 = vmatprep.subr.bf16.mxu1 %v769_v4  ;;  %v781_v18 = vld [vmem:[#allocation3] ss:$8 sps:$4 sm:$0xff]   ;;  %v789_v21 = vld [vmem:[#allocation3 + $0x54] ss:$8 sps:$4 sm:$0xff]   ;;  %v792_v23 = vld [vmem:[#allocation3 + $0x50] ss:$8 sps:$4 sm:$0xff]   ;;  %p857_p6 = pnand %p856_p5, %p850_p2 }
  0x2f   :  { %329 = vmatprep.mubr.bf16.mxu1 %v786_v12  ;;  %v784_v19 = vld [vmem:[#allocation3 + $0x40] ss:$8 sps:$4 sm:$0xff]   ;;  %v793_v24 = vld [vmem:[#allocation3 + $0x24] ss:$8 sps:$4 sm:$0xff]   ;;  %v799_v28 = vld [vmem:[#allocation3 + $0x34] ss:$8 sps:$4 sm:$0xff]  }
  0x30   :  { %v795_v25 = vld [vmem:[#allocation3 + $0x64] ss:$8 sps:$4 sm:$0xff]   ;;  %v797_v26 = vld [vmem:[#allocation3 + $0x20] ss:$8 sps:$4 sm:$0xff]   ;;  %v801_v29 = vld [vmem:[#allocation3 + $0x74] ss:$8 sps:$4 sm:$0xff]  }
  0x31   :  { %683 = vmatpush3.bf16.msra.mxu0 %v770_v5  ;;  %752 = vmatpush3.bf16.msra.mxu1 %v770_v5  ;;  %v798_v27 = vld [vmem:[#allocation3 + $0x60] ss:$8 sps:$4 sm:$0xff]   ;;  %v803_v30 = vld [vmem:[#allocation3 + $0x30] ss:$8 sps:$4 sm:$0xff]  }
  0x32   :  { %684 = vmatprep.subr.bf16.mxu0 %v771_v6  ;;  %745 = vmatprep.subr.bf16.mxu1 %v771_v6  ;;  %v804_v31 = vld [vmem:[#allocation3 + $0x70] ss:$8 sps:$4 sm:$0xff]  }
  0x35   :  { %685 = vmatpush3.bf16.msra.mxu0 %v772_v7  ;;  %753 = vmatpush3.bf16.msra.mxu1 %v772_v7 }
  0x36   :  { %686 = vmatprep.subr.bf16.mxu0 %v773_v8  ;;  %746 = vmatprep.subr.bf16.mxu1 %v773_v8 }
  0x39   :  { %687 = vmatpush3.bf16.msra.mxu0 %v774_v9  ;;  %754 = vmatpush3.bf16.msra.mxu1 %v774_v9 }
  0x3a   :  { %688 = vmatprep.subr.bf16.mxu0 %v775_v10  ;;  %747 = vmatprep.subr.bf16.mxu1 %v775_v10 }
  0x3d   :  { %689 = vmatpush3.bf16.msra.mxu0 %v776_v13  ;;  %755 = vmatpush3.bf16.msra.mxu1 %v776_v13 }
  0x3e   :  { %690 = vmatprep.subr.bf16.mxu0 %v777_v14  ;;  %748 = vmatprep.subr.bf16.mxu1 %v777_v14 }
  0x41   :  { %691 = vmatpush3.bf16.msra.mxu0 %v778_v15  ;;  %756 = vmatpush3.bf16.msra.mxu1 %v778_v15 }
  0x42   :  { %692 = vmatprep.subr.bf16.mxu0 %v779_v16  ;;  %749 = vmatprep.subr.bf16.mxu1 %v779_v16 }
  0x45   :  { %693 = vmatpush3.bf16.msra.mxu0 %v780_v17  ;;  %757 = vmatpush3.bf16.msra.mxu1 %v780_v17 }
  0x48   :  { %298 = vmatmul.mubr.bf16.vlgmr.msra.gmra.mrb[0].mxu0 %v781_v18  ;;  %330 = vmatmul.mubr.bf16.vlgmr.msra.gmra.mrb[0].mxu1 %v784_v19 }
  0x49   :  { %305 = vmatprep.mubr.bf16.mxu0 %v787_v20  ;;  %337 = vmatprep.mubr.bf16.mxu1 %v789_v21 }
  0x50   :  { %306 = vmatmul.mubr.bf16.gmra.mrb[4].mxu0 %v791_v22  ;;  %338 = vmatmul.mubr.bf16.gmra.mrb[4].mxu1 %v792_v23 }
  0x51   :  { %313 = vmatprep.mubr.bf16.mxu0 %v793_v24  ;;  %345 = vmatprep.mubr.bf16.mxu1 %v795_v25 }
  0x58   :  { %314 = vmatmul.mubr.bf16.gmra.mrb[8].mxu0 %v797_v26  ;;  %346 = vmatmul.mubr.bf16.gmra.mrb[8].mxu1 %v798_v27 }
  0x59   :  { %321 = vmatprep.mubr.bf16.mxu0 %v799_v28  ;;  %353 = vmatprep.mubr.bf16.mxu1 %v801_v29 }
  0x60   :  { %322 = vmatmul.mubr.bf16.gmra.mrb[12].mxu0 %v803_v30  ;;  %354 = vmatmul.mubr.bf16.gmra.mrb[12].mxu1 %v804_v31 }
 0x11b   :  { %v694_v32 = vpop.f32.mrb[0].mxu0  ;;  %v718_v33 = vpop.f32.mrb[0].mxu1 }
 0x11c   :  { %v695_v34 = vpop.f32.mrb[1].mxu0  ;;  %v719_v35 = vpop.f32.mrb[1].mxu1 }
 0x11d   :  { %v696_v36 = vadd.f32 %v695_v34, %v694_v32  ;;  %v720_v37 = vadd.f32 %v719_v35, %v718_v33  ;;  %v697_v38 = vpop.f32.mrb[2].mxu0  ;;  %v721_v39 = vpop.f32.mrb[2].mxu1 }
 0x11e   :  { %v698_v40 = vpop.f32.mrb[3].mxu0  ;;  %v722_v41 = vpop.f32.mrb[3].mxu1 }
 0x11f   :  { %v699_v42 = vadd.f32 %v698_v40, %v697_v38  ;;  %v723_v43 = vadd.f32 %v722_v41, %v721_v39 }
 0x121   :  { %v634_v44 = vpack.c.bf16 %v699_v42, %v696_v36  ;;  %v654_v45 = vpack.c.bf16 %v723_v43, %v720_v37 }
 0x123   :  { %635 = vst [vmem:[#allocation8] sm:$0xff] %v634_v44   ;;  %674 = vst [vmem:[#allocation8 + $0x20] sm:$0xff] %v654_v45   ;;  %v700_v46 = vpop.f32.mrb[4].mxu0  ;;  %v724_v47 = vpop.f32.mrb[4].mxu1 }
 0x124   :  { %v701_v48 = vpop.f32.mrb[5].mxu0  ;;  %v725_v49 = vpop.f32.mrb[5].mxu1 }
 0x125   :  { %v702_v50 = vadd.f32 %v701_v48, %v700_v46  ;;  %v726_v51 = vadd.f32 %v725_v49, %v724_v47  ;;  %v703_v52 = vpop.f32.mrb[6].mxu0  ;;  %v727_v53 = vpop.f32.mrb[6].mxu1 }
 0x126   :  { %v704_v54 = vpop.f32.mrb[7].mxu0  ;;  %v728_v55 = vpop.f32.mrb[7].mxu1 }
 0x127   :  { %v705_v56 = vadd.f32 %v704_v54, %v703_v52  ;;  %v729_v57 = vadd.f32 %v728_v55, %v727_v53 }
 0x129   :  { %v639_v58 = vpack.c.bf16 %v705_v56, %v702_v50  ;;  %v659_v59 = vpack.c.bf16 %v729_v57, %v726_v51 }
 0x12b   :  { %671 = vst [vmem:[#allocation8 + $0x8] sm:$0xff] %v639_v58   ;;  %675 = vst [vmem:[#allocation8 + $0x28] sm:$0xff] %v659_v59   ;;  %v706_v60 = vpop.f32.mrb[8].mxu0  ;;  %v730_v61 = vpop.f32.mrb[8].mxu1 }
 0x12c   :  { %v707_v62 = vpop.f32.mrb[9].mxu0  ;;  %v731_v63 = vpop.f32.mrb[9].mxu1 }
 0x12d   :  { %v708_v0 = vadd.f32 %v707_v62, %v706_v60  ;;  %v732_v1 = vadd.f32 %v731_v63, %v730_v61  ;;  %v709_v2 = vpop.f32.mrb[10].mxu0  ;;  %v733_v3 = vpop.f32.mrb[10].mxu1 }
 0x12e   :  { %v710_v4 = vpop.f32.mrb[11].mxu0  ;;  %v734_v5 = vpop.f32.mrb[11].mxu1 }
 0x12f   :  { %v711_v6 = vadd.f32 %v710_v4, %v709_v2  ;;  %v735_v7 = vadd.f32 %v734_v5, %v733_v3 }
 0x131   :  { %v644_v8 = vpack.c.bf16 %v711_v6, %v708_v0  ;;  %v664_v9 = vpack.c.bf16 %v735_v7, %v732_v1 }
 0x133   :  { %672 = vst [vmem:[#allocation8 + $0x10] sm:$0xff] %v644_v8   ;;  %676 = vst [vmem:[#allocation8 + $0x30] sm:$0xff] %v664_v9   ;;  %v712_v10 = vpop.f32.mrb[12].mxu0  ;;  %v736_v11 = vpop.f32.mrb[12].mxu1 }
 0x134   :  { %v713_v12 = vpop.f32.mrb[13].mxu0  ;;  %v737_v13 = vpop.f32.mrb[13].mxu1 }
 0x135   :  { %v714_v14 = vadd.f32 %v713_v12, %v712_v10  ;;  %v738_v15 = vadd.f32 %v737_v13, %v736_v11  ;;  %v715_v16 = vpop.f32.mrb[14].mxu0  ;;  %v739_v17 = vpop.f32.mrb[14].mxu1 }
 0x136   :  { %v716_v18 = vpop.f32.mrb[15].mxu0  ;;  %v740_v19 = vpop.f32.mrb[15].mxu1 }
 0x137   :  { %v717_v20 = vadd.f32 %v716_v18, %v715_v16  ;;  %v741_v21 = vadd.f32 %v740_v19, %v739_v17 }
 0x139   :  { %v649_v22 = vpack.c.bf16 %v717_v20, %v714_v14  ;;  %v669_v23 = vpack.c.bf16 %v741_v21, %v738_v15 }
 0x13b   :  { %673 = vst [vmem:[#allocation8 + $0x18] sm:$0xff] %v649_v22   ;;  %677 = vst [vmem:[#allocation8 + $0x38] sm:$0xff] %v669_v23  }
 0x13c   :  { %860 = shalt.err (!%p857_p6)
}
 0x13d   :  { %s861_s12 = scalar_lea.hbm %s943_s2, 1024 }
 0x13e   :  { %p862_p7 = scmp.ne.s32.totalorder %s943_s2, %s861_s12  ;;  %p865_p8 = scmp.lt.u32.totalorder %s861_s12, %s943_s2 }
 0x140   :  { %p867_p9 = pnand %p865_p8, %p862_p7 }
 0x142   :  { %870 = shalt.err (!%p867_p9)
}
 0x143   :  { %560 = dma.vmem_to_hbm [thread:$0]  %s555_s8, 1024, %s943_s2, [#allocation5], %s881_s0, %s881_s0, %s882_s5  }
 0x144   :  { %875 = dma.done.wait [#allocation5], 1024  }
 0x145   :  { %876 = vsyncadd [#allocation5], 4294966272 }
 0x146   :  { %564 = vsyncpa [#allocation4], 1 }
 0x147   :  { %565 = vsyncpa [#allocation7], 1 }
 0x148   :  { %566 = vsyncpa [#allocation5], 1 }

</bundles_post_ra>
